<compile_context>
chip_gen: v6e
topology: v6e:2x2x1
jax: 0.10.0
libtpu: 0.0.40
codegen_flags: <defaults>
</compile_context>

<pallas_src>
import functools
import math

import jax
import jax.numpy as jnp
from jax.experimental import pallas as pl
from jax.experimental.pallas import tpu as pltpu


def _rmsnorm_kernel(x_ref, w_ref, o_ref, *, eps: float, inv_dim: float):
    # x_ref: (tile_rows, dim), w_ref: (1, dim) already in o_ref.dtype.
    # NOTE: all math here is strictly per-row.  Rows of the ragged last block
    # that lie past the logical row count read garbage (possibly NaN/Inf) but
    # are never written back by Pallas.  Do NOT add any cross-row reduction
    # here without also padding/masking the input rows.
    x = x_ref[...].astype(jnp.float32)
    # mean(x^2) = sum(x^2) * (1/dim); 1/dim is a compile-time constant.
    ms = jnp.sum(x * x, axis=-1, keepdims=True) * inv_dim
    inv = jax.lax.rsqrt(ms + eps)          # EUP, off the VALU critical slots
    # Match the PyTorch module: normalize in f32, cast back to x.dtype, then
    # multiply by the (x.dtype) weight.
    o_ref[...] = (x * inv).astype(o_ref.dtype) * w_ref[...]


def _chip_vmem() -> tuple[int, int]:
    """(scoped-VMEM budget, physical per-TC VMEM) in bytes, chip-aware."""
    cap = 64 * 1024 * 1024  # conservative default (v7x per-TC VMEM)
    try:
        cap = int(pltpu.get_tpu_info().vmem_capacity_bytes)
    except Exception:
        pass
    # ~75% of physical, capped at 64 MiB:
    #   v7x (64 MiB)  -> 48 MiB budget (headroom for weight/sems/scratch)
    #   v5e/v6e (128) -> 64 MiB budget (bigger tiles, fewer grid steps)
    budget = int(min(cap * 3 // 4, 64 * 1024 * 1024))
    return budget, cap


def _pick_tile_rows(rows: int, dim: int, dtype, *,
                    vmem_budget_bytes: int,
                    target_block_bytes: int = 4 << 20) -> tuple[int, int]:
    """Largest row tile whose pipelined VMEM footprint fits the budget."""
    itemsize = jnp.dtype(dtype).itemsize
    # sublane packing: 8 rows for 4B dtypes, 16 for 2B, 32 for 1B
    sublane = max(8, 32 // max(1, itemsize))
    # dtype-aware f32 temporaries: for f32 inputs astype(f32) is a no-op, so
    # reserve ~4 B/elem; for narrower dtypes keep ~8 B/elem.
    temp_bytes = 4 if itemsize >= 4 else 8
    # per-row bytes: double-buffered input + double-buffered output
    # (4 * itemsize) plus f32 temporaries.
    per_row = dim * (4 * itemsize + temp_bytes)
    # Byte-targeted row cap: aim for >= target_block_bytes per input block so
    # small-dim shapes get large, well-overlapped DMAs instead of being
    # pipeline-overhead bound by a fixed 1024-row cap.
    max_tile = max(1024, target_block_bytes // max(dim * itemsize, 1))
    tile = vmem_budget_bytes // max(per_row, 1)
    tile = min(tile, max_tile, max(rows, 1))
    tile = max(sublane, (tile // sublane) * sublane)
    return int(tile), sublane


def rmsnorm(x: jax.Array, weight: jax.Array, eps: float, *,
            tile_rows: int | None = None):
    """RMSNorm over the last axis of x. x: (..., dim), weight: (dim,)."""
    orig_shape = x.shape
    dim = orig_shape[-1]
    rows = math.prod(orig_shape[:-1]) if len(orig_shape) > 1 else 1

    x2d = x.reshape(rows, dim)
    # One-time cast so the kernel's weight multiply needs no per-step cast.
    # NOTE: this rounds an f32 weight to x.dtype before the multiply, exactly
    # matching the PyTorch reference (output * self.weight after type_as(x)).
    w2d = weight.astype(x.dtype).reshape(1, dim)

    # Fast path wants dim % 128 == 0 (lane-dense, unmasked vst).  Non-multiple
    # dims still produce correct results (the block spans the full last axis)
    # but fall back to masked partial stores and padded DMAs.
    # TODO(synk): repack tiny/non-128-multiple dims outside the kernel if they
    # ever show up on the hot path.

    budget, cap = _chip_vmem()
    auto_tile, sublane = _pick_tile_rows(rows, dim, x.dtype,
                                         vmem_budget_bytes=budget)
    if tile_rows is None:
        tile_rows = auto_tile
    else:
        # Clamp a user-supplied tile to the chip's VMEM budget.
        tile_rows = max(sublane, min(int(tile_rows), auto_tile))
        tile_rows = (tile_rows // sublane) * sublane

    # Guarantee >= 2 grid steps when there is enough work, so the 1-D
    # "parallel" grid axis can shard across both v7x TensorCores.
    if pl.cdiv(rows, tile_rows) == 1 and rows > 2 * sublane:
        tile_rows = max(sublane, ((tile_rows // 2) // sublane) * sublane)

    grid = (pl.cdiv(rows, tile_rows),)

    itemsize = jnp.dtype(x.dtype).itemsize
    temp_bytes = 4 if itemsize >= 4 else 8
    tile_bytes = tile_rows * dim * (4 * itemsize + temp_bytes) + 2 * dim * itemsize
    # Scoped limit is the chip budget; only exceed it (up to ~cap) in the
    # degenerate huge-dim case where even a single-sublane tile overflows it.
    vmem_limit = int(min(max(budget, tile_bytes + (2 << 20)), cap * 15 // 16))

    cost = pl.CostEstimate(
        flops=4 * rows * dim,
        transcendentals=rows,
        bytes_accessed=2 * rows * dim * itemsize + dim * itemsize,
    )

    kernel = functools.partial(_rmsnorm_kernel, eps=float(eps),
                               inv_dim=1.0 / float(dim))
    out = pl.pallas_call(
        kernel,
        out_shape=jax.ShapeDtypeStruct((rows, dim), x.dtype),
        grid_spec=pltpu.PrefetchScalarGridSpec(
            num_scalar_prefetch=0,
            grid=grid,
            in_specs=[
                # Default double-buffering; only bump to pl.Buffered(3) if a
                # small-block profile shows exposed DMA and VMEM has slack.
                pl.BlockSpec((tile_rows, dim), lambda i: (i, 0)),
                pl.BlockSpec((1, dim), lambda i: (0, 0)),
            ],
            out_specs=pl.BlockSpec((tile_rows, dim), lambda i: (i, 0)),
        ),
        compiler_params=pltpu.CompilerParams(
            dimension_semantics=("parallel",),
            vmem_limit_bytes=vmem_limit,
        ),
        cost_estimate=cost,
    )(x2d, w2d)

    return out.reshape(orig_shape)


def rmsnorm_ref(x, weight, eps):
    xf = x.astype(jnp.float32)
    inv = jax.lax.rsqrt(jnp.mean(xf * xf, axis=-1, keepdims=True) + eps)
    return ((xf * inv).astype(x.dtype)) * weight.astype(x.dtype)


if __name__ == "__main__":
    eps = 1e-5

    # Small shapes consistent with the module's forward: (batch, seq, dim).
    key = jax.random.PRNGKey(0)
    batch, seq, dim = 2, 8, 32
    x = jax.random.normal(key, (batch, seq, dim), dtype=jnp.float32)
    weight = jnp.ones((dim,), dtype=jnp.float32)  # nn.Parameter(torch.ones(dim))

    out = jax.block_until_ready(rmsnorm(x, weight, eps))
    ref = rmsnorm_ref(x, weight, eps)
    assert out.shape == x.shape and out.dtype == x.dtype
    assert jnp.allclose(out, ref, atol=1e-5, rtol=1e-5)

    # Ragged row count + lane-dense (dim % 128 == 0) fast path.
    x2 = jax.random.normal(jax.random.PRNGKey(1), (3, 5, 128), dtype=jnp.float32)
    w2 = jax.random.normal(jax.random.PRNGKey(2), (128,), dtype=jnp.float32)
    out2 = jax.block_until_ready(rmsnorm(x2, w2, eps))
    ref2 = rmsnorm_ref(x2, w2, eps)
    assert out2.shape == x2.shape and out2.dtype == x2.dtype
    assert jnp.allclose(out2, ref2, atol=1e-5, rtol=1e-5)

    # Multiple grid steps with an explicit (clamped) user tile.
    x3 = jax.random.normal(jax.random.PRNGKey(3), (4, 16, 256), dtype=jnp.float32)
    w3 = jax.random.normal(jax.random.PRNGKey(4), (256,), dtype=jnp.float32)
    out3 = jax.block_until_ready(rmsnorm(x3, w3, eps, tile_rows=16))
    ref3 = rmsnorm_ref(x3, w3, eps)
    assert out3.shape == x3.shape and out3.dtype == x3.dtype
    assert jnp.allclose(out3, ref3, atol=1e-5, rtol=1e-5)

    print("KERNEL_OK")
</pallas_src>

<mosaic_0001>
module attributes {stable_mosaic.version = 11 : i64} {
  func.func @_rmsnorm_kernel(%arg0: i32, %arg1: memref<16x32xf32, #tpu.memory_space<vmem>>, %arg2: memref<1x32xf32, #tpu.memory_space<vmem>>, %arg3: memref<16x32xf32, #tpu.memory_space<vmem>>) attributes {dimension_semantics = [#tpu.dimension_semantics<parallel>], iteration_bounds = array<i64: 1>, scalar_prefetch = 0 : i64, scratch_operands = 0 : i64, tpu.core_type = #tpu.core_type<tc>, window_params = [{transform_indices = @transform_0, window_bounds = array<i64: 16, 32>}, {pipeline_mode = #tpu.pipeline_mode<synchronous>, transform_indices = @transform_1, window_bounds = array<i64: 1, 32>}, {transform_indices = @transform_2, window_bounds = array<i64: 16, 32>}]} {
    %c0 = arith.constant 0 : index
    %c0_0 = arith.constant 0 : index
    %0 = vector.load %arg1[%c0, %c0_0] : memref<16x32xf32, #tpu.memory_space<vmem>>, vector<16x32xf32>
    %1 = arith.mulf %0, %0 : vector<16x32xf32>
    %cst = arith.constant dense<0.000000e+00> : vector<16xf32>
    %2 = vector.multi_reduction <add>, %1, %cst [1] : vector<16x32xf32> to vector<16xf32>
    %3 = vector.shape_cast %2 : vector<16xf32> to vector<16x1xf32>
    %cst_1 = arith.constant 3.125000e-02 : f32
    %4 = vector.broadcast %cst_1 : f32 to vector<16x1xf32>
    %5 = arith.mulf %3, %4 : vector<16x1xf32>
    %cst_2 = arith.constant 9.99999974E-6 : f32
    %6 = vector.broadcast %cst_2 : f32 to vector<16x1xf32>
    %7 = arith.addf %5, %6 : vector<16x1xf32>
    %8 = math.rsqrt %7 : vector<16x1xf32>
    %9 = vector.broadcast %8 : vector<16x1xf32> to vector<16x32xf32>
    %10 = arith.mulf %0, %9 : vector<16x32xf32>
    %c0_3 = arith.constant 0 : index
    %c0_4 = arith.constant 0 : index
    %11 = vector.load %arg2[%c0_3, %c0_4] : memref<1x32xf32, #tpu.memory_space<vmem>>, vector<1x32xf32>
    %12 = vector.broadcast %11 : vector<1x32xf32> to vector<16x32xf32>
    %13 = arith.mulf %10, %12 : vector<16x32xf32>
    %c0_5 = arith.constant 0 : index
    %c0_6 = arith.constant 0 : index
    %14 = vector.load %arg3[%c0_5, %c0_6] : memref<16x32xf32, #tpu.memory_space<vmem>>, vector<16x32xf32>
    tpu.vector_store %arg3[%c0_5, %c0_6], %13 {strides = array<i32>} : memref<16x32xf32, #tpu.memory_space<vmem>>, vector<16x32xf32>,
    return
  }
  func.func @transform_0(%arg0: i32) -> (i32, i32) {
    %c0_i32 = arith.constant 0 : i32
    %c0_i32_0 = arith.constant 0 : i32
    return %arg0, %c0_i32 : i32, i32
  }
  func.func @transform_1(%arg0: i32) -> (i32, i32) {
    %c0_i32 = arith.constant 0 : i32
    %c0_i32_0 = arith.constant 0 : i32
    %c0_i32_1 = arith.constant 0 : i32
    return %c0_i32, %c0_i32_0 : i32, i32
  }
  func.func @transform_2(%arg0: i32) -> (i32, i32) {
    %c0_i32 = arith.constant 0 : i32
    %c0_i32_0 = arith.constant 0 : i32
    return %arg0, %c0_i32 : i32, i32
  }
}

</mosaic_0001>

<bundles_post_ra>
// kernel: tpu_custom_call.1
= control target key start
LH: loop header
LB: loop body
LE: loop exit
PB: predicated region body
PF: predicated region fallthrough
CT: control target
= control target key end

     0   :  { %7 = vsyncpa [#allocation3], 0  ;;  %s164_s0 = inlined_call_operand.hbm [shape: f32[16,32], index: 0, kind: input, shape index: {}]   ;;  %s165_s1 = inlined_call_operand.vmem [shape: f32[1,32], index: 1, kind: input, shape index: {}]   ;;  %s166_s2 = inlined_call_operand.hbm [shape: f32[16,32], index: 2, kind: output, shape index: {}]  }
   0x1   :  { %8 = vsyncpa [#allocation4], 0  ;;  %s126_s9 = smov [#allocation2]  }
   0x2   :  { %s14_s10 = sshll.u32 %s126_s9, 4  ;;  %s15_s10 = int_to_ptr.vmem [resolvable:$true] %s14_s10 }
   0x3   :  { %s90_s11 = scalar_lea.vmem %s15_s10, 256  ;;  %p95_p1 = scmp.lt.s32.totalorder %s15_s10, %s15_s10 }
   0x4   :  { %p91_p0 = scmp.ne.s32.totalorder %s15_s10, %s90_s11  ;;  %p96_p2 = scmp.lt.s32.totalorder %s90_s11, %s90_s11 }
   0x6   :  { %p97_p3 = por %p96_p2, %p95_p1 }
   0x8   :  { %p98_p4 = pnand %p97_p3, %p91_p0 }
   0xa   :  { %101 = shalt.err (!%p98_p4)
}
   0xb   :  { %s127_s12 = smov 128   ;;  %s128_s13 = smov 8  }
   0xc   :  { %20 = dma.hbm_to_vmem [thread:$0]  %s164_s0, 256, %s15_s10, [#allocation3], %s127_s12, %s127_s12, %s128_s13  }
   0xd   :  { %122 = dma.done.wait [#allocation3], 256  }
   0xe   :  { %123 = vsyncadd [#allocation3], 4294967040  ;;  %v26_v0 = vld [vmem:[#allocation2] sm:$0xff]  ;;  %vm30_vm0 = vcmask 261120   ;;  %v27_v1 = vld [vmem:[#allocation2 + $0x8] sm:$0xff]  ;;  %s129_s17 = smov [#allocation5]  }
   0xf   :  { %v28_v2 = vmul.f32 %v26_v0, %v26_v0  ;;  %v29_v3 = vmul.f32 %v27_v1, %v27_v1  ;;  %v73_v13 = vld [vmem:[%s165_s1] ss:$0 sm:$0xff]  ;;  %s61_s18 = sshll.u32 %s129_s17, 4  ;;  %s62_s18 = int_to_ptr.vmem [resolvable:$true] %s61_s18 }
  0x10   :  { %s102_s19 = scalar_lea.vmem %s62_s18, 256  ;;  %p107_p6 = scmp.lt.s32.totalorder %s62_s18, %s62_s18 }
  0x11   :  { %v31_v4 = vsel %vm30_vm0, %v28_v2, 0.0  ;;  %v34_v5 = vsel %vm30_vm0, %v29_v3, 0.0  ;;  %p103_p5 = scmp.ne.s32.totalorder %s62_s18, %s102_s19  ;;  %p108_p7 = scmp.lt.s32.totalorder %s102_s19, %s102_s19 }
  0x12   :  { %32 = vadd.xlane.f32.xlu0 %v31_v4 }
  0x13   :  { %p109_p8 = por %p108_p7, %p107_p6 }
  0x15   :  { %p110_p9 = pnand %p109_p8, %p103_p5 }
  0x16   :  { %35 = vadd.xlane.f32.xlu0 %v34_v5 }
  0x9b   :  { %v33_v6 = vpop.xlane.xlu0 %32 }
  0x9c   :  { %v37_v7 = vmul.f32 0.03125, %v33_v6 }
  0x9e   :  { %v39_v8 = vadd.f32 1e-05, %v37_v7 }
  0x9f   :  { %v36_v9 = vpop.xlane.xlu0 %35 }
  0xa0   :  { %78 = vrsqrt.f32 %v39_v8  ;;  %v38_v10 = vmul.f32 0.03125, %v36_v9 }
  0xa2   :  { %v40_v11 = vadd.f32 1e-05, %v38_v10 }
  0xa4   :  { %80 = vrsqrt.f32 %v40_v11 }
  0xad   :  { %v79_v12 = vpop.eup %78 }
  0xae   :  { %v43_v14 = vmul.f32 %v79_v12, %v26_v0 }
  0xb0   :  { %v52_v15 = vmul.f32 %v73_v13, %v43_v14 }
  0xb1   :  { %v81_v16 = vpop.eup %80 }
  0xb2   :  { %v44_v17 = vmul.f32 %v81_v16, %v27_v1  ;;  %54 = vst.msk [vmem:[#allocation5] sm:$0xff] %vm30_vm0, %v52_v15 }
  0xb4   :  { %v53_v18 = vmul.f32 %v73_v13, %v44_v17 }
  0xb6   :  { %55 = vst.msk [vmem:[#allocation5 + $0x8] sm:$0xff] %vm30_vm0, %v53_v18 }
  0xb7   :  { %113 = shalt.err (!%p110_p9)
}
  0xb8   :  { %67 = dma.vmem_to_hbm [thread:$0]  %s62_s18, 256, %s166_s2, [#allocation4], %s127_s12, %s127_s12, %s128_s13  }
  0xb9   :  { %124 = dma.done.wait [#allocation4], 256  }
  0xba   :  { %125 = vsyncadd [#allocation4], 4294967040 }
  0xbb   :  { %71 = vsyncpa [#allocation3], 1 }
  0xbc   :  { %72 = vsyncpa [#allocation4], 1 }

</bundles_post_ra>
